<compile_context>
chip_gen: v6e
topology: v6e:2x2x1
jax: 0.10.0
libtpu: 0.0.40
codegen_flags: <defaults>
</compile_context>

<pallas_src>
import jax
import jax.numpy as jnp
from jax import lax
from jax.experimental import pallas as pl
from jax.experimental.pallas import tpu as pltpu

EPS = 1e-8  # torch.nn.CosineSimilarity default eps


# --------------------------------------------------------------------------
# Kernels
# --------------------------------------------------------------------------
def _sim_kernel(x_ref, y_ref, ix_ref, iy_ref, o_ref):
    # x_ref: (TM, H), y_ref: (TN, H), ix_ref: (TM, 1), iy_ref: (1, TN)
    # A @ B^T without materializing a transpose: contract last axis of both.
    dots = lax.dot_general(
        x_ref[...], y_ref[...],
        dimension_numbers=(((1,), (1,)), ((), ())),
        preferred_element_type=jnp.float32,
    )
    # Epilogue: two f32 broadcast multiplies on the MXU result (1/temp is
    # already folded into ix).
    o_ref[...] = (dots * ix_ref[...] * iy_ref[...]).astype(o_ref.dtype)


def _sim_kernel_ktiled(x_ref, y_ref, ix_ref, iy_ref, o_ref, acc_ref):
    # Same as above but with the contraction tiled along H (grid axis 2).
    k = pl.program_id(2)

    @pl.when(k == 0)
    def _():
        acc_ref[...] = jnp.zeros_like(acc_ref)

    acc_ref[...] += lax.dot_general(
        x_ref[...], y_ref[...],
        dimension_numbers=(((1,), (1,)), ((), ())),
        preferred_element_type=jnp.float32,
    )

    @pl.when(k == pl.num_programs(2) - 1)
    def _():
        o_ref[...] = (acc_ref[...] * ix_ref[...] * iy_ref[...]).astype(o_ref.dtype)


# --------------------------------------------------------------------------
# Wrapper helpers
# --------------------------------------------------------------------------
def _round_up(n, m):
    return ((n + m - 1) // m) * m


def _sublane_multiple(dtype):
    # Second-minor tile grows as the dtype narrows: f32 -> 8, bf16 -> 16,
    # int8/fp8 -> 32.
    return max(8, 32 // jnp.dtype(dtype).itemsize)


def _to_2d(a):
    if a.ndim == 2:
        return a
    if a.ndim == 3:
        if a.shape[1] == 1:
            return jnp.squeeze(a, axis=1)   # (B, 1, H) -> (B, H)
        if a.shape[0] == 1:
            return jnp.squeeze(a, axis=0)   # (1, B, H) -> (B, H)
    raise ValueError(f"unsupported input shape {a.shape}")


def _vmem_budget_bytes():
    cap = 64 * 1024 * 1024  # conservative fallback (v7x physical VMEM)
    try:
        cap = int(pltpu.get_tpu_info().vmem_capacity_bytes)
    except Exception:
        pass
    # Leave headroom for Mosaic internal scratch; cap well below physical.
    return min(int(cap * 0.75), 96 * 1024 * 1024)


def _working_set_bytes(tm, tn, tk, in_bytes, ktiled):
    b = 2 * (tm * tk + tn * tk) * in_bytes   # double-buffered input tiles
    b += 2 * (tm + tn) * 4                   # inv-norm vectors (f32)
    b += 2 * tm * tn * 4                     # double-buffered f32 output tile
    if ktiled:
        b += tm * tn * 4                     # f32 accumulator scratch
    return b


def _choose_tiles(Bx, By, H, dtype, budget, block_m, block_n, block_k):
    sub = _sublane_multiple(dtype)
    in_bytes = jnp.dtype(dtype).itemsize
    tm = min(block_m, _round_up(Bx, sub))
    tn = min(block_n, _round_up(By, 128))
    ktiled = H > block_k
    tk = block_k if ktiled else H
    # Shrink until the working set fits the per-generation VMEM budget.
    while _working_set_bytes(tm, tn, tk, in_bytes, ktiled) > budget:
        if ktiled and tk > 512:
            tk = max(512, (tk // 2 // 128) * 128)
        elif tn >= tm and tn > 128:
            tn = max(128, (tn // 2 // 128) * 128)
        elif tm > sub:
            tm = max(sub, (tm // 2 // sub) * sub)
        elif tn > 128:
            tn = max(128, (tn // 2 // 128) * 128)
        else:
            break
    return tm, tn, tk, ktiled


# --------------------------------------------------------------------------
# Public entry point
# --------------------------------------------------------------------------
def similarity(x, y, temp, *, block_m=512, block_n=512, block_k=2048,
               mxu_dtype=None):
    """Pallas implementation of Similarity.forward.

    Accepts the SimCSE calling convention
        x: (B, 1, H), y: (1, B, H)  ->  out: (B, B)
    as well as plain 2-D inputs (Bx, H), (By, H) -> (Bx, By).

    mxu_dtype: optionally cast MXU operands (e.g. jnp.bfloat16 on v6e/v7x for
    f32 inputs). Norms and epilogue always run in f32.
    """
    x2 = _to_2d(x)
    y2 = _to_2d(y)

    Bx, H = x2.shape
    By, Hy = y2.shape
    assert H == Hy, (H, Hy)

    # ---- O(B*H) pre-pass: inverse row norms, 1/temp folded into x side ----
    x2f = x2.astype(jnp.float32)
    y2f = y2.astype(jnp.float32)
    inv_x = lax.rsqrt(
        jnp.maximum(jnp.sum(x2f * x2f, axis=-1, keepdims=True), EPS * EPS)
    ) * jnp.float32(1.0 / temp)                                   # (Bx, 1)
    inv_y = lax.rsqrt(
        jnp.maximum(jnp.sum(y2f * y2f, axis=-1, keepdims=True), EPS * EPS)
    ).reshape(1, By)                                              # (1, By)

    if mxu_dtype is not None and x2.dtype != mxu_dtype:
        x2 = x2.astype(mxu_dtype)
        y2 = y2.astype(mxu_dtype)

    # ---- tile selection under a per-generation VMEM budget ----------------
    budget = _vmem_budget_bytes()
    tm, tn, tk, ktiled = _choose_tiles(Bx, By, H, x2.dtype, budget,
                                       block_m, block_n, block_k)

    m_pad = _round_up(Bx, tm)
    n_pad = _round_up(By, tn)
    h_pad = _round_up(H, tk) if ktiled else H

    if m_pad != Bx or h_pad != H:
        x2 = jnp.pad(x2, ((0, m_pad - Bx), (0, h_pad - H)))
        inv_x = jnp.pad(inv_x, ((0, m_pad - Bx), (0, 0)))
    if n_pad != By or h_pad != H:
        y2 = jnp.pad(y2, ((0, n_pad - By), (0, h_pad - H)))
        inv_y = jnp.pad(inv_y, ((0, 0), (0, n_pad - By)))

    compiler_params_kwargs = dict(vmem_limit_bytes=budget)

    if ktiled:
        grid = (m_pad // tm, n_pad // tn, h_pad // tk)
        in_specs = [
            pl.BlockSpec((tm, tk), lambda i, j, k: (i, k)),
            pl.BlockSpec((tn, tk), lambda i, j, k: (j, k)),
            pl.BlockSpec((tm, 1), lambda i, j, k: (i, 0)),
            pl.BlockSpec((1, tn), lambda i, j, k: (0, j)),
        ]
        out_specs = pl.BlockSpec((tm, tn), lambda i, j, k: (i, j))
        scratch_shapes = [pltpu.VMEM((tm, tn), jnp.float32)]
        kernel = _sim_kernel_ktiled
        dim_sem = ("parallel", "parallel", "arbitrary")
    else:
        grid = (m_pad // tm, n_pad // tn)
        in_specs = [
            pl.BlockSpec((tm, H), lambda i, j: (i, 0)),
            pl.BlockSpec((tn, H), lambda i, j: (j, 0)),
            pl.BlockSpec((tm, 1), lambda i, j: (i, 0)),
            pl.BlockSpec((1, tn), lambda i, j: (0, j)),
        ]
        out_specs = pl.BlockSpec((tm, tn), lambda i, j: (i, j))
        scratch_shapes = []
        kernel = _sim_kernel
        dim_sem = ("parallel", "parallel")

    out = pl.pallas_call(
        kernel,
        out_shape=jax.ShapeDtypeStruct((m_pad, n_pad), jnp.float32),
        grid_spec=pltpu.PrefetchScalarGridSpec(
            num_scalar_prefetch=0,
            grid=grid,
            in_specs=in_specs,
            out_specs=out_specs,
            scratch_shapes=scratch_shapes,
        ),
        compiler_params=pltpu.CompilerParams(
            dimension_semantics=dim_sem,
            **compiler_params_kwargs,
        ),
    )(x2, y2, inv_x, inv_y)

    if m_pad != Bx or n_pad != By:
        out = out[:Bx, :By]
    return out


# --------------------------------------------------------------------------
# Reference + test
# --------------------------------------------------------------------------
def _reference(x, y, temp):
    # Plain-JAX reference mirroring torch.nn.CosineSimilarity(dim=-1) / temp
    x2 = _to_2d(x).astype(jnp.float32)
    y2 = _to_2d(y).astype(jnp.float32)
    dots = x2 @ y2.T
    xn = jnp.maximum(jnp.linalg.norm(x2, axis=-1, keepdims=True), EPS)
    yn = jnp.maximum(jnp.linalg.norm(y2, axis=-1, keepdims=True), EPS)
    return dots / (xn * yn.T) / temp


if __name__ == "__main__":
    B, H = 8, 32
    temp = 0.05  # SimCSE default temperature

    key = jax.random.PRNGKey(0)
    kx, ky = jax.random.split(key)
    # SimCSE shapes: x = z1.unsqueeze(1), y = z2.unsqueeze(0)
    x = jax.random.normal(kx, (B, 1, H), dtype=jnp.float32)
    y = jax.random.normal(ky, (1, B, H), dtype=jnp.float32)

    out = similarity(x, y, temp)
    out = jax.block_until_ready(out)

    ref = _reference(x, y, temp)
    assert out.shape == (B, B), out.shape
    assert jnp.allclose(out, ref, atol=1e-3, rtol=1e-3), "mismatch vs reference"

    print("KERNEL_OK")
</pallas_src>

<mosaic_0001>
module attributes {stable_mosaic.version = 11 : i64} {
  func.func @_sim_kernel(%arg0: i32, %arg1: i32, %arg2: memref<8x32xf32, #tpu.memory_space<vmem>>, %arg3: memref<128x32xf32, #tpu.memory_space<vmem>>, %arg4: memref<8x1xf32, #tpu.memory_space<vmem>>, %arg5: memref<1x128xf32, #tpu.memory_space<vmem>>, %arg6: memref<8x128xf32, #tpu.memory_space<vmem>>) attributes {dimension_semantics = [#tpu.dimension_semantics<parallel>, #tpu.dimension_semantics<parallel>], iteration_bounds = array<i64: 1, 1>, scalar_prefetch = 0 : i64, scratch_operands = 0 : i64, tpu.core_type = #tpu.core_type<tc>, window_params = [{transform_indices = @transform_0, window_bounds = array<i64: 8, 32>}, {transform_indices = @transform_1, window_bounds = array<i64: 128, 32>}, {transform_indices = @transform_2, window_bounds = array<i64: 8, 1>}, {transform_indices = @transform_3, window_bounds = array<i64: 1, 128>}, {transform_indices = @transform_4, window_bounds = array<i64: 8, 128>}]} {
    %c0 = arith.constant 0 : index
    %c0_0 = arith.constant 0 : index
    %0 = vector.load %arg2[%c0, %c0_0] : memref<8x32xf32, #tpu.memory_space<vmem>>, vector<8x32xf32>
    %c0_1 = arith.constant 0 : index
    %c0_2 = arith.constant 0 : index
    %1 = vector.load %arg3[%c0_1, %c0_2] : memref<128x32xf32, #tpu.memory_space<vmem>>, vector<128x32xf32>
    %cst = arith.constant dense<0.000000e+00> : vector<8x128xf32>
    %2 = tpu.matmul %0, %1, %cst {dimension_numbers = #tpu.dot_dimension_numbers<[1], [1], [0], [0], [0, 0, 1, 0], [], []>} : vector<8x32xf32>, vector<128x32xf32>, vector<8x128xf32> -> vector<8x128xf32>
    %c0_3 = arith.constant 0 : index
    %c0_4 = arith.constant 0 : index
    %3 = vector.load %arg4[%c0_3, %c0_4] : memref<8x1xf32, #tpu.memory_space<vmem>>, vector<8x1xf32>
    %4 = vector.broadcast %3 : vector<8x1xf32> to vector<8x128xf32>
    %5 = arith.mulf %2, %4 : vector<8x128xf32>
    %c0_5 = arith.constant 0 : index
    %c0_6 = arith.constant 0 : index
    %6 = vector.load %arg5[%c0_5, %c0_6] : memref<1x128xf32, #tpu.memory_space<vmem>>, vector<1x128xf32>
    %7 = vector.broadcast %6 : vector<1x128xf32> to vector<8x128xf32>
    %8 = arith.mulf %5, %7 : vector<8x128xf32>
    %c0_7 = arith.constant 0 : index
    %c0_8 = arith.constant 0 : index
    %9 = vector.load %arg6[%c0_7, %c0_8] : memref<8x128xf32, #tpu.memory_space<vmem>>, vector<8x128xf32>
    tpu.vector_store %arg6[%c0_7, %c0_8], %8 {strides = array<i32>} : memref<8x128xf32, #tpu.memory_space<vmem>>, vector<8x128xf32>,
    return
  }
  func.func @transform_0(%arg0: i32, %arg1: i32) -> (i32, i32) {
    %c0_i32 = arith.constant 0 : i32
    %c0_i32_0 = arith.constant 0 : i32
    return %arg0, %c0_i32 : i32, i32
  }
  func.func @transform_1(%arg0: i32, %arg1: i32) -> (i32, i32) {
    %c0_i32 = arith.constant 0 : i32
    %c0_i32_0 = arith.constant 0 : i32
    return %arg1, %c0_i32 : i32, i32
  }
  func.func @transform_2(%arg0: i32, %arg1: i32) -> (i32, i32) {
    %c0_i32 = arith.constant 0 : i32
    %c0_i32_0 = arith.constant 0 : i32
    return %arg0, %c0_i32 : i32, i32
  }
  func.func @transform_3(%arg0: i32, %arg1: i32) -> (i32, i32) {
    %c0_i32 = arith.constant 0 : i32
    %c0_i32_0 = arith.constant 0 : i32
    return %c0_i32, %arg1 : i32, i32
  }
  func.func @transform_4(%arg0: i32, %arg1: i32) -> (i32, i32) {
    %c0_i32 = arith.constant 0 : i32
    return %arg0, %arg1 : i32, i32
  }
}

</mosaic_0001>

<bundles_post_ra>
// kernel: tpu_custom_call.1
= control target key start
LH: loop header
LB: loop body
LE: loop exit
PB: predicated region body
PF: predicated region fallthrough
CT: control target
= control target key end

     0   :  { %vm35_vm0 = vcmask 261120   ;;  %v284_v1 = vmov 0.0   ;;  %vm285_vm1 = vmmov 0   ;;  %v286_v2 = vmov 0   ;;  %s390_s0 = inlined_call_operand.vmem [shape: f32[8,32], index: 0, kind: input, shape index: {}]   ;;  %s391_s1 = inlined_call_operand.vmem [shape: f32[128,32], index: 1, kind: input, shape index: {}]   ;;  %s392_s2 = inlined_call_operand.vmem [shape: f32[8,1], index: 2, kind: input, shape index: {}]   ;;  %s393_s3 = inlined_call_operand.vmem [shape: f32[1,128], index: 3, kind: input, shape index: {}]   ;;  %s394_s4 = inlined_call_operand.hbm [shape: f32[8,128], index: 4, kind: output, shape index: {}]  }
   0x1   :  { %v34_v0 = vld [vmem:[%s391_s1 + $0x78] sm:$0xff]  ;;  %222 = vmatprep.subr.mxu0 %v284_v1  ;;  %254 = vmatprep.mubr.msk.f32.mxu0 %vm285_vm1, %v284_v1  ;;  %v33_v3 = vld [vmem:[%s391_s1 + $0x70] sm:$0xff]  ;;  %v157_v4 = vld [vmem:[%s392_s2] sm:$0xff] }
   0x2   :  { %223 = vmatpush3.xpose.msk.msra.mxu0 %vm35_vm0, %v34_v0  ;;  %261 = vset.pattern.permute.xlu0 %v286_v2 }
   0x3   :  { %224 = vmatprep.subr.mxu0 %v284_v1  ;;  %160 = vperm.xlu0 %261, %v157_v4  }
   0x6   :  { %225 = vmatpush3.xpose.msk.msra.mxu0 %vm35_vm0, %v33_v3 }
   0x7   :  { %9 = vsyncpa [#allocation3], 0  ;;  %226 = vmatprep.subr.mxu0 %v284_v1  ;;  %v32_v5 = vld [vmem:[%s391_s1 + $0x68] sm:$0xff]  ;;  %v31_v6 = vld [vmem:[%s391_s1 + $0x60] sm:$0xff]  ;;  %s287_s25 = smov [#allocation2]  }
   0x8   :  { %v30_v7 = vld [vmem:[%s391_s1 + $0x58] sm:$0xff]  ;;  %v29_v8 = vld [vmem:[%s391_s1 + $0x50] sm:$0xff]  ;;  %v28_v9 = vld [vmem:[%s391_s1 + $0x48] sm:$0xff]  ;;  %s179_s26 = sshll.u32 %s287_s25, 4  ;;  %s180_s26 = int_to_ptr.vmem [resolvable:$true] %s179_s26 }
   0x9   :  { %v27_v10 = vld [vmem:[%s391_s1 + $0x40] sm:$0xff]  ;;  %v26_v11 = vld [vmem:[%s391_s1 + $0x38] sm:$0xff]  ;;  %v25_v12 = vld [vmem:[%s391_s1 + $0x30] sm:$0xff]  ;;  %p267_p1 = scmp.lt.s32.totalorder %s180_s26, %s180_s26 }
   0xa   :  { %227 = vmatpush3.xpose.msk.msra.mxu0 %vm35_vm0, %v32_v5  ;;  %v24_v13 = vld [vmem:[%s391_s1 + $0x28] sm:$0xff]  ;;  %v23_v14 = vld [vmem:[%s391_s1 + $0x20] sm:$0xff]  ;;  %v22_v15 = vld [vmem:[%s391_s1 + $0x18] sm:$0xff] }
   0xb   :  { %228 = vmatprep.subr.mxu0 %v284_v1  ;;  %v21_v16 = vld [vmem:[%s391_s1 + $0x10] sm:$0xff]  ;;  %v20_v17 = vld [vmem:[%s391_s1 + $0x8] sm:$0xff]  ;;  %v19_v18 = vld [vmem:[%s391_s1] sm:$0xff]  ;;  %s262_s1 = scalar_lea.vmem %s180_s26, 128 }
   0xc   :  { %v18_v19 = vld [vmem:[%s390_s0] sm:$0xff]  ;;  %p263_p0 = scmp.ne.s32.totalorder %s180_s26, %s262_s1  ;;  %p268_p2 = scmp.lt.s32.totalorder %s262_s1, %s262_s1 }
   0xd   :  { %v204_v22 = vld [vmem:[%s393_s3] ss:$0 sm:$0xff] }
   0xe   :  { %229 = vmatpush3.xpose.msk.msra.mxu0 %vm35_vm0, %v31_v6  ;;  %p269_p3 = por %p268_p2, %p267_p1 }
   0xf   :  { %230 = vmatprep.subr.mxu0 %v284_v1 }
  0x10   :  { %p270_p4 = pnand %p269_p3, %p263_p0 }
  0x12   :  { %231 = vmatpush3.xpose.msk.msra.mxu0 %vm35_vm0, %v30_v7 }
  0x13   :  { %232 = vmatprep.subr.mxu0 %v284_v1 }
  0x16   :  { %233 = vmatpush3.xpose.msk.msra.mxu0 %vm35_vm0, %v29_v8 }
  0x17   :  { %234 = vmatprep.subr.mxu0 %v284_v1 }
  0x1a   :  { %235 = vmatpush3.xpose.msk.msra.mxu0 %vm35_vm0, %v28_v9 }
  0x1b   :  { %236 = vmatprep.subr.mxu0 %v284_v1 }
  0x1e   :  { %237 = vmatpush3.xpose.msk.msra.mxu0 %vm35_vm0, %v27_v10 }
  0x1f   :  { %238 = vmatprep.subr.mxu0 %v284_v1 }
  0x22   :  { %239 = vmatpush3.xpose.msk.msra.mxu0 %vm35_vm0, %v26_v11 }
  0x23   :  { %240 = vmatprep.subr.mxu0 %v284_v1 }
  0x26   :  { %241 = vmatpush3.xpose.msk.msra.mxu0 %vm35_vm0, %v25_v12 }
  0x27   :  { %242 = vmatprep.subr.mxu0 %v284_v1 }
  0x2a   :  { %243 = vmatpush3.xpose.msk.msra.mxu0 %vm35_vm0, %v24_v13 }
  0x2b   :  { %244 = vmatprep.subr.mxu0 %v284_v1 }
  0x2e   :  { %245 = vmatpush3.xpose.msk.msra.mxu0 %vm35_vm0, %v23_v14 }
  0x2f   :  { %246 = vmatprep.subr.mxu0 %v284_v1 }
  0x32   :  { %247 = vmatpush3.xpose.msk.msra.mxu0 %vm35_vm0, %v22_v15 }
  0x33   :  { %248 = vmatprep.subr.mxu0 %v284_v1 }
  0x36   :  { %249 = vmatpush3.xpose.msk.msra.mxu0 %vm35_vm0, %v21_v16 }
  0x37   :  { %250 = vmatprep.subr.mxu0 %v284_v1 }
  0x3a   :  { %251 = vmatpush3.xpose.msk.msra.mxu0 %vm35_vm0, %v20_v17 }
  0x3b   :  { %252 = vmatprep.subr.mxu0 %v284_v1 }
  0x3e   :  { %253 = vmatpush3.xpose.msk.msra.mxu0 %vm35_vm0, %v19_v18 }
  0x41   :  { %255 = vmatmul.mubr.msk.f32.vlgmr.msra.gmra.mxu0 %vm35_vm0, %v18_v19 }
  0x7e   :  { %v161_v20 = vpop.permute.xlu0 %160 }
 0x101   :  { %v153_v21 = vpop.f32.mrf.mxu0 }
 0x102   :  { %v163_v23 = vmul.f32 %v161_v20, %v153_v21 }
 0x103   :  { %v256_v24 = vpop.f32.mrf.mxu0 }
 0x104   :  { %v171_v25 = vmul.f32 %v204_v22, %v163_v23 }
 0x106   :  { %172 = vst [vmem:[#allocation2] sm:$0xff] %v171_v25 }
 0x107   :  { %273 = shalt.err (!%p270_p4)
}
 0x108   :  { %182 = dma.vmem_to_hbm [thread:$0]  %s180_s26, 128, %s394_s4, [#allocation3]  }
 0x109   :  { %282 = dma.done.wait [#allocation3], 128  }
 0x10a   :  { %283 = vsyncadd [#allocation3], 4294967168 }
 0x10b   :  { %186 = vsyncpa [#allocation3], 1 }

</bundles_post_ra>
